<compile_context>
chip_gen: v6e
topology: v6e:2x2x1
jax: 0.10.0
libtpu: 0.0.40
codegen_flags: <defaults>
</compile_context>

<pallas_src>
import functools

import jax
import jax.numpy as jnp
from jax.experimental import pallas as pl
from jax.experimental.pallas import tpu as pltpu


# ----------------------------------------------------------------------------
# Hardware-aware sizing helpers
# ----------------------------------------------------------------------------
def _vmem_capacity_bytes():
    try:
        return int(pltpu.get_tpu_info().vmem_capacity_bytes)
    except Exception:
        return 64 * 1024 * 1024        # conservative (v7x-sized) fallback


def _maybe_pad_lanes(n, max_overhead_frac=0.125):
    """Round n up to a multiple of 128 only if the relative overhead is small."""
    if n % 128 == 0:
        return n
    p = ((n + 127) // 128) * 128
    if (p - n) <= max_overhead_frac * n:
        return p
    return n


def _pick_tile_rows(h_out, w_out, row_bytes, max_rows, budget):
    """Largest divisor of h_out with TS=rows*w_out sublane-aligned (or full),
    <= max_rows, and rows*row_bytes <= budget."""
    aligned = [r for r in range(1, h_out + 1)
               if h_out % r == 0 and (((r * w_out) % 8 == 0) or r == h_out)]
    small = [r for r in aligned if r <= max_rows]
    fitting = [r for r in small if r * row_bytes <= budget]
    if fitting:
        return max(fitting)
    if small:
        return min(small)
    return min(aligned)


# ----------------------------------------------------------------------------
# Kernel 1: involution-kernel generation (1x1 conv [BN folded] -> ReLU ->
# 1x1 conv), tiled over flattened spatial positions.
#   x_ref: (TN, C); o_ref: (TN, K2Gp)
# ----------------------------------------------------------------------------
def _kernel_gen_kernel(x_ref, w1_ref, b1_ref, w2_ref, b2_ref, o_ref):
    h = jnp.dot(x_ref[...], w1_ref[...], preferred_element_type=jnp.float32)
    h = jnp.maximum(h + b1_ref[...], 0.0)          # folded BN bias + ReLU
    h = h.astype(w2_ref.dtype)
    o = jnp.dot(h, w2_ref[...], preferred_element_type=jnp.float32) + b2_ref[...]
    o_ref[...] = o.astype(o_ref.dtype)


# ----------------------------------------------------------------------------
# Kernel 2: involution aggregation over one (batch, row-tile) block.
#   x_ref : (1, s*s, Hs, Ws, C)  space-to-depth padded input (full image)
#   w_ref : (1, TS, K2Gp)        generated kernels, TS = tile_rows * W_out
#   e_ref : (G, C)               0/1 group -> channel expansion matrix
#   o_ref : (1, TS, C)           float32
# ----------------------------------------------------------------------------
def _involution_agg_kernel(x_ref, w_ref, e_ref, o_ref, *,
                           K, stride, tile_rows, w_out, n_ch, n_groups):
    s = stride
    ts = tile_rows * w_out
    h0 = pl.program_id(1) * tile_rows
    if tile_rows % 8 == 0:
        h0 = pl.multiple_of(h0, 8)

    e = e_ref[...]                                            # (G, C), exact 0/1
    # Keep the accumulator in vregs only when it comfortably fits; otherwise
    # accumulate directly into the VMEM output block (no register spills).
    use_vreg_acc = (ts * n_ch * 4) <= (64 * 1024)
    acc = None
    for kh in range(K):
        for kw in range(K):
            phase = (kh % s) * s + (kw % s)
            xs = x_ref[0, phase,
                       pl.ds(h0 + kh // s, tile_rows),
                       pl.ds(kw // s, w_out), :]              # (tile_rows, w_out, C)
            tap = kh * K + kw
            wk = w_ref[0, :, pl.ds(tap * n_groups, n_groups)]  # (TS, G), static off
            # group -> group_channels broadcast on the MXU, single bf16 pass
            wfull = jnp.dot(wk, e, preferred_element_type=jnp.float32)   # (TS, C)
            contrib = xs.astype(jnp.float32).reshape(ts, n_ch) * wfull
            if use_vreg_acc:
                acc = contrib if acc is None else acc + contrib
            else:
                if kh == 0 and kw == 0:
                    o_ref[0] = contrib
                else:
                    o_ref[0] += contrib
    if use_vreg_acc:
        o_ref[0] = acc


# ----------------------------------------------------------------------------
# Wrapper (glue: transposes, pad, space-to-depth, parameter folding)
# ----------------------------------------------------------------------------
def involution_forward(x_nchw, params, kernel_size, stride, *,
                       compute_dtype=jnp.float32):
    B, C, H, W = x_nchw.shape
    K = kernel_size
    gc = 4                                   # group_channels (fixed in module)
    assert C % gc == 0, "in_channels must be divisible by group_channels=4"
    G = C // gc                              # groups
    K2 = K * K
    K2G = K2 * G
    Cmid = params["w1"].shape[0]             # in_channels // reduction_ratio
    pad = (K - 1) // 2
    s = stride
    item = jnp.dtype(compute_dtype).itemsize

    vmem_cap = _vmem_capacity_bytes()
    vmem_limit = int(vmem_cap * 0.8)         # headroom for Mosaic internals
    big_vmem = vmem_cap > (64 << 20)         # 128 MiB parts (v5e/v6e) vs v7x

    x = jnp.transpose(x_nchw, (0, 2, 3, 1)).astype(jnp.float32)   # NHWC

    # ---- kernel-generation input (avg-pool when stride > 1) ----
    if s > 1:
        Hp, Wp = H // s, W // s
        xw = x[:, :Hp * s, :Wp * s, :].reshape(B, Hp, s, Wp, s, C).mean(axis=(2, 4))
    else:
        Hp, Wp = H, W
        xw = x
    H_out = (H + 2 * pad - K) // s + 1
    W_out = (W + 2 * pad - K) // s + 1
    # same constraint the PyTorch module's .view() implicitly enforces
    assert (Hp, Wp) == (H_out, W_out), "pooled and unfolded spatial sizes differ"

    N = B * Hp * Wp
    x2d = xw.reshape(N, C).astype(compute_dtype)

    # Fold BN (inference) into conv1's weight/bias.  Permute conv2's output
    # channels from (g, k) to (k, g) ordering so the kernel-gen output reshapes
    # straight into (B, H*W, K2*G).  Optionally zero-pad the output columns up
    # to a lane-dense multiple of 128 (stores become unmasked vst).
    scale = (params["gamma"] / jnp.sqrt(params["rvar"] + 1e-5)).astype(jnp.float32)
    shift = (params["beta"] - params["rmean"] * scale).astype(jnp.float32)
    w1f = jnp.transpose(params["w1"]).astype(jnp.float32) * scale[None, :]   # (C, Cmid)
    b1f = params["b1"].astype(jnp.float32) * scale + shift                    # (Cmid,)
    w2p = jnp.transpose(params["w2"].reshape(G, K2, Cmid), (1, 0, 2)).reshape(K2G, Cmid)
    b2p = jnp.transpose(params["b2"].reshape(G, K2)).reshape(K2G).astype(jnp.float32)

    K2Gp = _maybe_pad_lanes(K2G)
    if K2Gp != K2G:
        w2p = jnp.pad(w2p, ((0, K2Gp - K2G), (0, 0)))
        b2p = jnp.pad(b2p, (0, K2Gp - K2G))
    w1f = w1f.astype(compute_dtype)
    w2t = jnp.transpose(w2p).astype(compute_dtype)                            # (Cmid, K2Gp)

    # ---- kernel-generation branch, tiled over flattened positions ----
    tn_cap = 2048 if big_vmem else 1024
    TN = N if N <= tn_cap else tn_cap
    kgen = pl.pallas_call(
        _kernel_gen_kernel,
        out_shape=jax.ShapeDtypeStruct((N, K2Gp), compute_dtype),
        grid=(pl.cdiv(N, TN),),
        in_specs=[
            pl.BlockSpec((TN, C), lambda i: (i, 0)),
            pl.BlockSpec((C, Cmid), lambda i: (0, 0)),
            pl.BlockSpec((1, Cmid), lambda i: (0, 0)),
            pl.BlockSpec((Cmid, K2Gp), lambda i: (0, 0)),
            pl.BlockSpec((1, K2Gp), lambda i: (0, 0)),
        ],
        out_specs=pl.BlockSpec((TN, K2Gp), lambda i: (i, 0)),
        compiler_params=pltpu.CompilerParams(
            dimension_semantics=("parallel",),
            vmem_limit_bytes=vmem_limit),
    )(x2d, w1f, b1f.reshape(1, Cmid), w2t, b2p.reshape(1, K2Gp))

    # Un-broadcast generated kernels: (B, H_out*W_out, K2Gp).  Pure reshape.
    wk = kgen.reshape(B, H_out * W_out, K2Gp)

    # ---- aggregation input: cast first, then pad + space-to-depth so every
    #      tap reads a contiguous window (stride phases on a small axis) ----
    Hpad, Wpad = H + 2 * pad, W + 2 * pad
    Hpad_s = -(-Hpad // s) * s
    Wpad_s = -(-Wpad // s) * s
    xc = x.astype(compute_dtype)             # cast BEFORE pad/space-to-depth
    xp = jnp.pad(xc, ((0, 0),
                      (pad, pad + (Hpad_s - Hpad)),
                      (pad, pad + (Wpad_s - Wpad)),
                      (0, 0)))
    Hs, Ws = Hpad_s // s, Wpad_s // s
    xp = xp.reshape(B, Hs, s, Ws, s, C)
    xp = jnp.transpose(xp, (0, 2, 4, 1, 3, 5)).reshape(B, s * s, Hs, Ws, C)

    # 0/1 matrix mapping group g -> channels [g*gc, (g+1)*gc)
    expand = (jnp.arange(C)[None, :] // gc ==
              jnp.arange(G)[:, None]).astype(compute_dtype)           # (G, C)

    # ---- generation-aware row-tile choice ----
    x_block_bytes = s * s * Hs * Ws * C * item           # single-buffered x block
    row_bytes = W_out * (2 * K2Gp * item + 2 * C * 4)    # wk + out blocks (x2 buf)
    misc = 2 * G * C * item + (2 << 20)
    max_rows = 32 if big_vmem else 8
    budget = max(vmem_limit - x_block_bytes - misc, row_bytes)
    TH = _pick_tile_rows(H_out, W_out, row_bytes, max_rows, budget)
    TS = TH * W_out
    n_row_tiles = H_out // TH

    agg_kernel = functools.partial(_involution_agg_kernel,
                                   K=K, stride=s, tile_rows=TH, w_out=W_out,
                                   n_ch=C, n_groups=G)

    def _call_agg(single_buffer_x):
        if single_buffer_x:
            # x's block index is constant across the inner row-tile axis, so a
            # single buffer halves its VMEM residency (key for v7x's 64 MiB).
            x_spec = pl.BlockSpec((1, s * s, Hs, Ws, C),
                                  lambda b, t: (b, 0, 0, 0, 0),
                                  pipeline_mode=pl.Buffered(1))
        else:
            x_spec = pl.BlockSpec((1, s * s, Hs, Ws, C),
                                  lambda b, t: (b, 0, 0, 0, 0))
        return pl.pallas_call(
            agg_kernel,
            out_shape=jax.ShapeDtypeStruct((B, H_out * W_out, C), jnp.float32),
            grid=(B, n_row_tiles),
            in_specs=[
                x_spec,
                pl.BlockSpec((1, TS, K2Gp), lambda b, t: (b, t, 0)),
                pl.BlockSpec((G, C), lambda b, t: (0, 0)),
            ],
            out_specs=pl.BlockSpec((1, TS, C), lambda b, t: (b, t, 0)),
            compiler_params=pltpu.CompilerParams(
                dimension_semantics=("parallel", "parallel"),
                vmem_limit_bytes=vmem_limit),
        )(xp, wk, expand)

    try:
        agg = _call_agg(True)
    except Exception:
        agg = _call_agg(False)      # fallback: default double-buffered x block

    out = agg.reshape(B, H_out, W_out, C)
    return jnp.transpose(out, (0, 3, 1, 2))                 # back to NCHW


# ----------------------------------------------------------------------------
# Pure-JAX reference of the PyTorch forward (inference-mode BN), for checking.
# ----------------------------------------------------------------------------
def involution_ref(x_nchw, params, kernel_size, stride):
    B, C, H, W = x_nchw.shape
    K = kernel_size
    gc = 4
    G = C // gc
    K2 = K * K
    pad = (K - 1) // 2

    xw = x_nchw
    if stride > 1:
        xw = xw.reshape(B, C, H // stride, stride, W // stride, stride).mean(axis=(3, 5))
    h = jnp.einsum('bchw,oc->bohw', xw, params["w1"]) + params["b1"][None, :, None, None]
    scale = params["gamma"] / jnp.sqrt(params["rvar"] + 1e-5)
    shift = params["beta"] - params["rmean"] * scale
    h = h * scale[None, :, None, None] + shift[None, :, None, None]
    h = jnp.maximum(h, 0.0)
    wgt = jnp.einsum('bchw,oc->bohw', h, params["w2"]) + params["b2"][None, :, None, None]
    Ho, Wo = wgt.shape[2], wgt.shape[3]
    wgt = wgt.reshape(B, G, K2, Ho, Wo)

    xpad = jnp.pad(x_nchw, ((0, 0), (0, 0), (pad, pad), (pad, pad)))
    patches = jnp.stack(
        [xpad[:, :,
              kh:kh + (Ho - 1) * stride + 1:stride,
              kw:kw + (Wo - 1) * stride + 1:stride]
         for kh in range(K) for kw in range(K)], axis=2)     # (B, C, K2, Ho, Wo)
    patches = patches.reshape(B, G, gc, K2, Ho, Wo)
    out = (wgt[:, :, None] * patches).sum(axis=3).reshape(B, C, Ho, Wo)
    return out


if __name__ == "__main__":
    B, C, H, W = 2, 8, 16, 16        # in_channels=8 -> groups=2, group_channels=4
    K = 3
    Cmid = C // 4                    # reduction_ratio = 4
    G = C // 4
    K2G = K * K * G

    key = jax.random.PRNGKey(0)
    ks = jax.random.split(key, 8)
    x = jax.random.normal(ks[0], (B, C, H, W), jnp.float32)

    params = dict(
        w1=0.3 * jax.random.normal(ks[1], (Cmid, C), jnp.float32),      # conv1 weight
        b1=0.1 * jax.random.normal(ks[2], (Cmid,), jnp.float32),        # conv1 bias
        gamma=1.0 + 0.1 * jax.random.normal(ks[3], (Cmid,), jnp.float32),
        beta=0.1 * jax.random.normal(ks[4], (Cmid,), jnp.float32),
        rmean=0.1 * jax.random.normal(ks[5], (Cmid,), jnp.float32),
        rvar=1.0 + 0.05 * jnp.abs(jax.random.normal(ks[6], (Cmid,), jnp.float32)),
        w2=0.3 * jax.random.normal(ks[7], (K2G, Cmid), jnp.float32),    # conv2 weight
        b2=jnp.linspace(-0.1, 0.1, K2G).astype(jnp.float32),            # conv2 bias
    )

    for stride in (1, 2):
        out = jax.block_until_ready(involution_forward(x, params, K, stride))
        ref = involution_ref(x, params, K, stride)
        assert out.shape == ref.shape
        err = float(jnp.max(jnp.abs(out - ref)))
        # Tolerance sized for default-precision MXU (single bf16 pass) on the
        # kernel-gen matmuls AND the group-expand matmul (HIGHEST was dropped
        # per perf review); structural errors would be O(1).
        assert jnp.allclose(out, ref, atol=2e-2, rtol=2e-2), (stride, err)

    print("KERNEL_OK")
</pallas_src>

<mosaic_0001>
module attributes {stable_mosaic.version = 11 : i64} {
  func.func @_kernel_gen_kernel(%arg0: i32, %arg1: memref<512x8xf32, #tpu.memory_space<vmem>>, %arg2: memref<8x2xf32, #tpu.memory_space<vmem>>, %arg3: memref<1x2xf32, #tpu.memory_space<vmem>>, %arg4: memref<2x18xf32, #tpu.memory_space<vmem>>, %arg5: memref<1x18xf32, #tpu.memory_space<vmem>>, %arg6: memref<512x18xf32, #tpu.memory_space<vmem>>) attributes {dimension_semantics = [#tpu.dimension_semantics<parallel>], iteration_bounds = array<i64: 1>, scalar_prefetch = 0 : i64, scratch_operands = 0 : i64, tpu.core_type = #tpu.core_type<tc>, window_params = [{transform_indices = @transform_0, window_bounds = array<i64: 512, 8>}, {pipeline_mode = #tpu.pipeline_mode<synchronous>, transform_indices = @transform_1, window_bounds = array<i64: 8, 2>}, {pipeline_mode = #tpu.pipeline_mode<synchronous>, transform_indices = @transform_2, window_bounds = array<i64: 1, 2>}, {pipeline_mode = #tpu.pipeline_mode<synchronous>, transform_indices = @transform_3, window_bounds = array<i64: 2, 18>}, {pipeline_mode = #tpu.pipeline_mode<synchronous>, transform_indices = @transform_4, window_bounds = array<i64: 1, 18>}, {transform_indices = @transform_5, window_bounds = array<i64: 512, 18>}]} {
    %c0 = arith.constant 0 : index
    %c0_0 = arith.constant 0 : index
    %0 = vector.load %arg1[%c0, %c0_0] : memref<512x8xf32, #tpu.memory_space<vmem>>, vector<512x8xf32>
    %c0_1 = arith.constant 0 : index
    %c0_2 = arith.constant 0 : index
    %1 = vector.load %arg2[%c0_1, %c0_2] : memref<8x2xf32, #tpu.memory_space<vmem>>, vector<8x2xf32>
    %cst = arith.constant dense<0.000000e+00> : vector<512x2xf32>
    %2 = tpu.matmul %0, %1, %cst {dimension_numbers = #tpu.dot_dimension_numbers<[1], [0], [0], [1], [0, 0, 1, 1], [], []>} : vector<512x8xf32>, vector<8x2xf32>, vector<512x2xf32> -> vector<512x2xf32>
    %c0_3 = arith.constant 0 : index
    %c0_4 = arith.constant 0 : index
    %3 = vector.load %arg3[%c0_3, %c0_4] : memref<1x2xf32, #tpu.memory_space<vmem>>, vector<1x2xf32>
    %4 = vector.broadcast %3 : vector<1x2xf32> to vector<512x2xf32>
    %5 = arith.addf %2, %4 : vector<512x2xf32>
    %cst_5 = arith.constant 0.000000e+00 : f32
    %6 = vector.broadcast %cst_5 : f32 to vector<512x2xf32>
    %7 = arith.maximumf %5, %6 : vector<512x2xf32>
    %c0_6 = arith.constant 0 : index
    %c0_7 = arith.constant 0 : index
    %8 = vector.load %arg4[%c0_6, %c0_7] : memref<2x18xf32, #tpu.memory_space<vmem>>, vector<2x18xf32>
    %cst_8 = arith.constant dense<0.000000e+00> : vector<512x18xf32>
    %9 = tpu.matmul %7, %8, %cst_8 {dimension_numbers = #tpu.dot_dimension_numbers<[1], [0], [0], [1], [0, 0, 1, 1], [], []>} : vector<512x2xf32>, vector<2x18xf32>, vector<512x18xf32> -> vector<512x18xf32>
    %c0_9 = arith.constant 0 : index
    %c0_10 = arith.constant 0 : index
    %10 = vector.load %arg5[%c0_9, %c0_10] : memref<1x18xf32, #tpu.memory_space<vmem>>, vector<1x18xf32>
    %11 = vector.broadcast %10 : vector<1x18xf32> to vector<512x18xf32>
    %12 = arith.addf %9, %11 : vector<512x18xf32>
    %c0_11 = arith.constant 0 : index
    %c0_12 = arith.constant 0 : index
    %13 = vector.load %arg6[%c0_11, %c0_12] : memref<512x18xf32, #tpu.memory_space<vmem>>, vector<512x18xf32>
    tpu.vector_store %arg6[%c0_11, %c0_12], %12 {strides = array<i32>} : memref<512x18xf32, #tpu.memory_space<vmem>>, vector<512x18xf32>,
    return
  }
  func.func @transform_0(%arg0: i32) -> (i32, i32) {
    %c0_i32 = arith.constant 0 : i32
    %c0_i32_0 = arith.constant 0 : i32
    return %arg0, %c0_i32 : i32, i32
  }
  func.func @transform_1(%arg0: i32) -> (i32, i32) {
    %c0_i32 = arith.constant 0 : i32
    %c0_i32_0 = arith.constant 0 : i32
    %c0_i32_1 = arith.constant 0 : i32
    return %c0_i32, %c0_i32_0 : i32, i32
  }
  func.func @transform_2(%arg0: i32) -> (i32, i32) {
    %c0_i32 = arith.constant 0 : i32
    %c0_i32_0 = arith.constant 0 : i32
    %c0_i32_1 = arith.constant 0 : i32
    return %c0_i32, %c0_i32_0 : i32, i32
  }
  func.func @transform_3(%arg0: i32) -> (i32, i32) {
    %c0_i32 = arith.constant 0 : i32
    %c0_i32_0 = arith.constant 0 : i32
    %c0_i32_1 = arith.constant 0 : i32
    return %c0_i32, %c0_i32_0 : i32, i32
  }
  func.func @transform_4(%arg0: i32) -> (i32, i32) {
    %c0_i32 = arith.constant 0 : i32
    %c0_i32_0 = arith.constant 0 : i32
    %c0_i32_1 = arith.constant 0 : i32
    return %c0_i32, %c0_i32_0 : i32, i32
  }
  func.func @transform_5(%arg0: i32) -> (i32, i32) {
    %c0_i32 = arith.constant 0 : i32
    %c0_i32_0 = arith.constant 0 : i32
    return %arg0, %c0_i32 : i32, i32
  }
}

</mosaic_0001>

<bundles_post_ra>
// kernel: tpu_custom_call.1
= control target key start
LH: loop header
LB: loop body
LE: loop exit
PB: predicated region body
PF: predicated region fallthrough
CT: control target
= control target key end

     0   :  { %vm92_vm0 = vcmask 64512   ;;  %vm935_vm1 = vcmask 1041408   ;;  %vm742_vm2 = vcmask 15360   ;;  %vm1324_vm3 = vcmask 146432   ;;  %s2600_s1 = inlined_call_operand.vmem [shape: f32[8,2], index: 1, kind: input, shape index: {}]   ;;  %s2601_s0 = inlined_call_operand.vmem [shape: f32[512,8], index: 0, kind: input, shape index: {}]   ;;  %s2602_s3 = inlined_call_operand.vmem [shape: f32[2,18], index: 3, kind: input, shape index: {}]   ;;  %s2603_s2 = inlined_call_operand.vmem [shape: f32[1,2], index: 2, kind: input, shape index: {}]   ;;  %s2604_s4 = inlined_call_operand.vmem [shape: f32[1,18], index: 4, kind: input, shape index: {}]   ;;  %s2605_s5 = inlined_call_operand.vmem [shape: f32[512,18], index: 5, kind: output, shape index: {}]  }
   0x1   :  { %v84_v0 = vld [vmem:[%s2600_s1] sm:$0xff]  ;;  %v21_v2 = vld [vmem:[%s2601_s0 + $0x8] sm:$0xff]  ;;  %v22_v3 = vld [vmem:[%s2601_s0 + $0x10] sm:$0xff] }
   0x2   :  { %v20_v1 = vld [vmem:[%s2601_s0] sm:$0xff]  ;;  %1654 = vmatprep.subr.mxu0 %v84_v0  ;;  %v23_v4 = vld [vmem:[%s2601_s0 + $0x18] sm:$0xff]  ;;  %v25_v6 = vld [vmem:[%s2601_s0 + $0x28] sm:$0xff] }
   0x3   :  { %1656 = vmatprep.mubr.msk.f32.mxu0 %vm92_vm0, %v20_v1  ;;  %1655 = vmatpush3.msra.mxu0 %v84_v0  ;;  %v24_v5 = vld [vmem:[%s2601_s0 + $0x20] sm:$0xff]  ;;  %v26_v7 = vld [vmem:[%s2601_s0 + $0x30] sm:$0xff]  ;;  %v27_v8 = vld [vmem:[%s2601_s0 + $0x38] sm:$0xff] }
   0x4   :  { %1657 = vmatmul.mubr.msk.f32.vlgmr.msra.gmra.mxu0 %vm92_vm0, %v21_v2  ;;  %v28_v9 = vld [vmem:[%s2601_s0 + $0x40] sm:$0xff]  ;;  %v29_v10 = vld [vmem:[%s2601_s0 + $0x48] sm:$0xff]  ;;  %v30_v11 = vld [vmem:[%s2601_s0 + $0x50] sm:$0xff] }
   0x5   :  { %1659 = vmatprep.mubr.msk.f32.mxu0 %vm92_vm0, %v22_v3  ;;  %v31_v12 = vld [vmem:[%s2601_s0 + $0x58] sm:$0xff]  ;;  %v32_v13 = vld [vmem:[%s2601_s0 + $0x60] sm:$0xff]  ;;  %v33_v14 = vld [vmem:[%s2601_s0 + $0x68] sm:$0xff] }
   0x6   :  { %v34_v15 = vld [vmem:[%s2601_s0 + $0x70] sm:$0xff]  ;;  %v35_v16 = vld [vmem:[%s2601_s0 + $0x78] sm:$0xff]  ;;  %v36_v17 = vld [vmem:[%s2601_s0 + $0x80] sm:$0xff] }
   0x7   :  { %v37_v18 = vld [vmem:[%s2601_s0 + $0x88] sm:$0xff]  ;;  %v38_v19 = vld [vmem:[%s2601_s0 + $0x90] sm:$0xff]  ;;  %v39_v20 = vld [vmem:[%s2601_s0 + $0x98] sm:$0xff] }
   0x8   :  { %1660 = vmatmul.mubr.msk.f32.gmra.mxu0 %vm92_vm0, %v23_v4  ;;  %v40_v21 = vld [vmem:[%s2601_s0 + $0xa0] sm:$0xff]  ;;  %v41_v22 = vld [vmem:[%s2601_s0 + $0xa8] sm:$0xff]  ;;  %v42_v23 = vld [vmem:[%s2601_s0 + $0xb0] sm:$0xff] }
   0x9   :  { %1662 = vmatprep.mubr.msk.f32.mxu0 %vm92_vm0, %v24_v5  ;;  %v43_v24 = vld [vmem:[%s2601_s0 + $0xb8] sm:$0xff]  ;;  %v44_v25 = vld [vmem:[%s2601_s0 + $0xc0] sm:$0xff]  ;;  %v45_v26 = vld [vmem:[%s2601_s0 + $0xc8] sm:$0xff] }
   0xa   :  { %v46_v27 = vld [vmem:[%s2601_s0 + $0xd0] sm:$0xff]  ;;  %v47_v28 = vld [vmem:[%s2601_s0 + $0xd8] sm:$0xff]  ;;  %v48_v29 = vld [vmem:[%s2601_s0 + $0xe0] sm:$0xff] }
   0xb   :  { %v49_v30 = vld [vmem:[%s2601_s0 + $0xe8] sm:$0xff]  ;;  %v50_v31 = vld [vmem:[%s2601_s0 + $0xf0] sm:$0xff]  ;;  %v51_v32 = vld [vmem:[%s2601_s0 + $0xf8] sm:$0xff] }
   0xc   :  { %1663 = vmatmul.mubr.msk.f32.gmra.mxu0 %vm92_vm0, %v25_v6  ;;  %v52_v33 = vld [vmem:[%s2601_s0 + $0x100] sm:$0xff]  ;;  %v53_v34 = vld [vmem:[%s2601_s0 + $0x108] sm:$0xff]  ;;  %v54_v35 = vld [vmem:[%s2601_s0 + $0x110] sm:$0xff] }
   0xd   :  { %1665 = vmatprep.mubr.msk.f32.mxu0 %vm92_vm0, %v26_v7  ;;  %v55_v36 = vld [vmem:[%s2601_s0 + $0x118] sm:$0xff]  ;;  %v56_v37 = vld [vmem:[%s2601_s0 + $0x120] sm:$0xff]  ;;  %v57_v38 = vld [vmem:[%s2601_s0 + $0x128] sm:$0xff] }
   0xe   :  { %v734_v39 = vld [vmem:[%s2602_s3] sm:$0x3]  ;;  %v58_v40 = vld [vmem:[%s2601_s0 + $0x130] sm:$0xff]  ;;  %v59_v41 = vld [vmem:[%s2601_s0 + $0x138] sm:$0xff] }
   0xf   :  { %1752 = vmatprep.subr.msk.mxu1 %vm935_vm1, %v734_v39  ;;  %v60_v42 = vld [vmem:[%s2601_s0 + $0x140] sm:$0xff]  ;;  %v61_v43 = vld [vmem:[%s2601_s0 + $0x148] sm:$0xff]  ;;  %v62_v44 = vld [vmem:[%s2601_s0 + $0x150] sm:$0xff] }
  0x10   :  { %1666 = vmatmul.mubr.msk.f32.gmra.mxu0 %vm92_vm0, %v27_v8  ;;  %1753 = vmatpush3.msk.msra.mxu1 %vm935_vm1, %v734_v39  ;;  %v63_v45 = vld [vmem:[%s2601_s0 + $0x158] sm:$0xff]  ;;  %v64_v46 = vld [vmem:[%s2601_s0 + $0x160] sm:$0xff]  ;;  %v65_v47 = vld [vmem:[%s2601_s0 + $0x168] sm:$0xff] }
  0x11   :  { %1668 = vmatprep.mubr.msk.f32.mxu0 %vm92_vm0, %v28_v9  ;;  %v66_v48 = vld [vmem:[%s2601_s0 + $0x170] sm:$0xff]  ;;  %v67_v49 = vld [vmem:[%s2601_s0 + $0x178] sm:$0xff]  ;;  %v68_v50 = vld [vmem:[%s2601_s0 + $0x180] sm:$0xff] }
  0x12   :  { %v69_v51 = vld [vmem:[%s2601_s0 + $0x188] sm:$0xff]  ;;  %v70_v52 = vld [vmem:[%s2601_s0 + $0x190] sm:$0xff]  ;;  %v71_v53 = vld [vmem:[%s2601_s0 + $0x198] sm:$0xff] }
  0x13   :  { %v72_v54 = vld [vmem:[%s2601_s0 + $0x1a0] sm:$0xff]  ;;  %v73_v55 = vld [vmem:[%s2601_s0 + $0x1a8] sm:$0xff]  ;;  %v74_v56 = vld [vmem:[%s2601_s0 + $0x1b0] sm:$0xff] }
  0x14   :  { %1669 = vmatmul.mubr.msk.f32.gmra.mxu0 %vm92_vm0, %v29_v10  ;;  %v75_v57 = vld [vmem:[%s2601_s0 + $0x1b8] sm:$0xff]  ;;  %v76_v58 = vld [vmem:[%s2601_s0 + $0x1c0] sm:$0xff]  ;;  %v77_v59 = vld [vmem:[%s2601_s0 + $0x1c8] sm:$0xff] }
  0x15   :  { %1671 = vmatprep.mubr.msk.f32.mxu0 %vm92_vm0, %v30_v11  ;;  %v78_v60 = vld [vmem:[%s2601_s0 + $0x1d0] sm:$0xff]  ;;  %v79_v61 = vld [vmem:[%s2601_s0 + $0x1d8] sm:$0xff]  ;;  %v80_v62 = vld [vmem:[%s2601_s0 + $0x1e0] sm:$0xff] }
  0x16   :  { %v81_v63 = vld [vmem:[%s2601_s0 + $0x1e8] sm:$0xff]  ;;  %v82_v0 = vld [vmem:[%s2601_s0 + $0x1f0] sm:$0xff]  ;;  %v83_v1 = vld [vmem:[%s2601_s0 + $0x1f8] sm:$0xff] }
  0x17   :  { %v2145_v2 = vld [vmem:[%s2603_s2] ss:$0 sm:$0xff] }
  0x18   :  { %1672 = vmatmul.mubr.msk.f32.gmra.mxu0 %vm92_vm0, %v31_v12 }
  0x19   :  { %1674 = vmatprep.mubr.msk.f32.mxu0 %vm92_vm0, %v32_v13 }
  0x1c   :  { %1675 = vmatmul.mubr.msk.f32.gmra.mxu0 %vm92_vm0, %v33_v14 }
  0x1d   :  { %1677 = vmatprep.mubr.msk.f32.mxu0 %vm92_vm0, %v34_v15 }
  0x20   :  { %1678 = vmatmul.mubr.msk.f32.gmra.mxu0 %vm92_vm0, %v35_v16 }
  0x21   :  { %1680 = vmatprep.mubr.msk.f32.mxu0 %vm92_vm0, %v36_v17 }
  0x24   :  { %1681 = vmatmul.mubr.msk.f32.gmra.mxu0 %vm92_vm0, %v37_v18 }
  0x25   :  { %1683 = vmatprep.mubr.msk.f32.mxu0 %vm92_vm0, %v38_v19 }
  0x28   :  { %1684 = vmatmul.mubr.msk.f32.gmra.mxu0 %vm92_vm0, %v39_v20 }
  0x29   :  { %1686 = vmatprep.mubr.msk.f32.mxu0 %vm92_vm0, %v40_v21 }
  0x2c   :  { %1687 = vmatmul.mubr.msk.f32.gmra.mxu0 %vm92_vm0, %v41_v22 }
  0x2d   :  { %1689 = vmatprep.mubr.msk.f32.mxu0 %vm92_vm0, %v42_v23 }
  0x30   :  { %1690 = vmatmul.mubr.msk.f32.gmra.mxu0 %vm92_vm0, %v43_v24 }
  0x31   :  { %1692 = vmatprep.mubr.msk.f32.mxu0 %vm92_vm0, %v44_v25 }
  0x34   :  { %1693 = vmatmul.mubr.msk.f32.gmra.mxu0 %vm92_vm0, %v45_v26 }
  0x35   :  { %1695 = vmatprep.mubr.msk.f32.mxu0 %vm92_vm0, %v46_v27 }
  0x38   :  { %1696 = vmatmul.mubr.msk.f32.gmra.mxu0 %vm92_vm0, %v47_v28 }
  0x39   :  { %1698 = vmatprep.mubr.msk.f32.mxu0 %vm92_vm0, %v48_v29 }
  0x3c   :  { %1699 = vmatmul.mubr.msk.f32.gmra.mxu0 %vm92_vm0, %v49_v30 }
  0x3d   :  { %1701 = vmatprep.mubr.msk.f32.mxu0 %vm92_vm0, %v50_v31 }
  0x40   :  { %1702 = vmatmul.mubr.msk.f32.gmra.mxu0 %vm92_vm0, %v51_v32 }
  0x41   :  { %1704 = vmatprep.mubr.msk.f32.mxu0 %vm92_vm0, %v52_v33 }
  0x44   :  { %1705 = vmatmul.mubr.msk.f32.gmra.mxu0 %vm92_vm0, %v53_v34 }
  0x45   :  { %1707 = vmatprep.mubr.msk.f32.mxu0 %vm92_vm0, %v54_v35 }
  0x48   :  { %1708 = vmatmul.mubr.msk.f32.gmra.mxu0 %vm92_vm0, %v55_v36 }
  0x49   :  { %1710 = vmatprep.mubr.msk.f32.mxu0 %vm92_vm0, %v56_v37 }
  0x4c   :  { %1711 = vmatmul.mubr.msk.f32.gmra.mxu0 %vm92_vm0, %v57_v38 }
  0x4d   :  { %1713 = vmatprep.mubr.msk.f32.mxu0 %vm92_vm0, %v58_v40 }
  0x50   :  { %1714 = vmatmul.mubr.msk.f32.gmra.mxu0 %vm92_vm0, %v59_v41 }
  0x51   :  { %1716 = vmatprep.mubr.msk.f32.mxu0 %vm92_vm0, %v60_v42 }
  0x54   :  { %1717 = vmatmul.mubr.msk.f32.gmra.mxu0 %vm92_vm0, %v61_v43 }
  0x55   :  { %1719 = vmatprep.mubr.msk.f32.mxu0 %vm92_vm0, %v62_v44 }
  0x58   :  { %1720 = vmatmul.mubr.msk.f32.gmra.mxu0 %vm92_vm0, %v63_v45 }
  0x59   :  { %1722 = vmatprep.mubr.msk.f32.mxu0 %vm92_vm0, %v64_v46 }
  0x5c   :  { %1723 = vmatmul.mubr.msk.f32.gmra.mxu0 %vm92_vm0, %v65_v47 }
  0x5d   :  { %1725 = vmatprep.mubr.msk.f32.mxu0 %vm92_vm0, %v66_v48 }
  0x60   :  { %1726 = vmatmul.mubr.msk.f32.gmra.mxu0 %vm92_vm0, %v67_v49 }
  0x61   :  { %1728 = vmatprep.mubr.msk.f32.mxu0 %vm92_vm0, %v68_v50 }
  0x64   :  { %1729 = vmatmul.mubr.msk.f32.gmra.mxu0 %vm92_vm0, %v69_v51 }
  0x65   :  { %1731 = vmatprep.mubr.msk.f32.mxu0 %vm92_vm0, %v70_v52 }
  0x68   :  { %1732 = vmatmul.mubr.msk.f32.gmra.mxu0 %vm92_vm0, %v71_v53 }
  0x69   :  { %1734 = vmatprep.mubr.msk.f32.mxu0 %vm92_vm0, %v72_v54 }
  0x6c   :  { %1735 = vmatmul.mubr.msk.f32.gmra.mxu0 %vm92_vm0, %v73_v55 }
  0x6d   :  { %1737 = vmatprep.mubr.msk.f32.mxu0 %vm92_vm0, %v74_v56 }
  0x70   :  { %1738 = vmatmul.mubr.msk.f32.gmra.mxu0 %vm92_vm0, %v75_v57 }
  0x71   :  { %1740 = vmatprep.mubr.msk.f32.mxu0 %vm92_vm0, %v76_v58 }
  0x74   :  { %1741 = vmatmul.mubr.msk.f32.gmra.mxu0 %vm92_vm0, %v77_v59 }
  0x75   :  { %1743 = vmatprep.mubr.msk.f32.mxu0 %vm92_vm0, %v78_v60 }
  0x78   :  { %1744 = vmatmul.mubr.msk.f32.gmra.mxu0 %vm92_vm0, %v79_v61 }
  0x79   :  { %1746 = vmatprep.mubr.msk.f32.mxu0 %vm92_vm0, %v80_v62 }
  0x7c   :  { %1747 = vmatmul.mubr.msk.f32.gmra.mxu0 %vm92_vm0, %v81_v63 }
  0x7d   :  { %1749 = vmatprep.mubr.msk.f32.mxu0 %vm92_vm0, %v82_v0 }
  0x80   :  { %1750 = vmatmul.mubr.msk.f32.gmra.mxu0 %vm92_vm0, %v83_v1 }
  0xc4   :  { %v1658_v3 = vpop.f32.mrf.mxu0 }
  0xc5   :  { %v357_v4 = vadd.f32 %v1658_v3, %v2145_v2 }
  0xc6   :  { %v351_v5 = vpop.f32.mrf.mxu0 }
  0xc7   :  { %v352_v6 = vadd.f32 %v2145_v2, %v351_v5  ;;  %v671_v9 = vmax.f32 %v357_v4, 0.0 }
  0xc8   :  { %v1661_v7 = vpop.f32.mrf.mxu0 }
  0xc9   :  { %v670_v8 = vmax.f32 %v352_v6, 0.0  ;;  %v367_v10 = vadd.f32 %v1661_v7, %v2145_v2 }
  0xca   :  { %v361_v11 = vpop.f32.mrf.mxu0 }
  0xcb   :  { %v362_v12 = vadd.f32 %v2145_v2, %v361_v11  ;;  %1754 = vmatprep.mubr.msk.f32.mxu1 %vm742_vm2, %v670_v8  ;;  %v673_v15 = vmax.f32 %v367_v10, 0.0 }
  0xcc   :  { %v1664_v13 = vpop.f32.mrf.mxu0  ;;  %1755 = vmatmul.mubr.msk.f32.vlgmr.msra.gmra.mxu1 %vm742_vm2, %v671_v9 }
  0xcd   :  { %v672_v14 = vmax.f32 %v362_v12, 0.0  ;;  %v377_v16 = vadd.f32 %v1664_v13, %v2145_v2 }
  0xce   :  { %v371_v17 = vpop.f32.mrf.mxu0 }
  0xcf   :  { %v372_v18 = vadd.f32 %v2145_v2, %v371_v17  ;;  %1757 = vmatprep.mubr.msk.f32.mxu1 %vm742_vm2, %v672_v14  ;;  %v675_v21 = vmax.f32 %v377_v16, 0.0 }
  0xd0   :  { %v1667_v19 = vpop.f32.mrf.mxu0  ;;  %1758 = vmatmul.mubr.msk.f32.gmra.mxu1 %vm742_vm2, %v673_v15 }
  0xd1   :  { %v674_v20 = vmax.f32 %v372_v18, 0.0  ;;  %v387_v22 = vadd.f32 %v1667_v19, %v2145_v2 }
  0xd2   :  { %v381_v23 = vpop.f32.mrf.mxu0 }
  0xd3   :  { %v382_v24 = vadd.f32 %v2145_v2, %v381_v23  ;;  %1760 = vmatprep.mubr.msk.f32.mxu1 %vm742_vm2, %v674_v20  ;;  %v677_v27 = vmax.f32 %v387_v22, 0.0 }
  0xd4   :  { %v1670_v25 = vpop.f32.mrf.mxu0  ;;  %1761 = vmatmul.mubr.msk.f32.gmra.mxu1 %vm742_vm2, %v675_v21 }
  0xd5   :  { %v676_v26 = vmax.f32 %v382_v24, 0.0  ;;  %v397_v28 = vadd.f32 %v1670_v25, %v2145_v2 }
  0xd6   :  { %v391_v29 = vpop.f32.mrf.mxu0 }
  0xd7   :  { %v392_v30 = vadd.f32 %v2145_v2, %v391_v29  ;;  %1763 = vmatprep.mubr.msk.f32.mxu1 %vm742_vm2, %v676_v26  ;;  %v679_v33 = vmax.f32 %v397_v28, 0.0 }
  0xd8   :  { %v1673_v31 = vpop.f32.mrf.mxu0  ;;  %1764 = vmatmul.mubr.msk.f32.gmra.mxu1 %vm742_vm2, %v677_v27 }
  0xd9   :  { %v678_v32 = vmax.f32 %v392_v30, 0.0  ;;  %v407_v34 = vadd.f32 %v1673_v31, %v2145_v2 }
  0xda   :  { %v401_v35 = vpop.f32.mrf.mxu0 }
  0xdb   :  { %v402_v36 = vadd.f32 %v2145_v2, %v401_v35  ;;  %1766 = vmatprep.mubr.msk.f32.mxu1 %vm742_vm2, %v678_v32  ;;  %v681_v39 = vmax.f32 %v407_v34, 0.0 }
  0xdc   :  { %v1676_v37 = vpop.f32.mrf.mxu0  ;;  %1767 = vmatmul.mubr.msk.f32.gmra.mxu1 %vm742_vm2, %v679_v33 }
  0xdd   :  { %v680_v38 = vmax.f32 %v402_v36, 0.0  ;;  %v417_v40 = vadd.f32 %v1676_v37, %v2145_v2 }
  0xde   :  { %v411_v41 = vpop.f32.mrf.mxu0 }
  0xdf   :  { %v412_v42 = vadd.f32 %v2145_v2, %v411_v41  ;;  %1769 = vmatprep.mubr.msk.f32.mxu1 %vm742_vm2, %v680_v38  ;;  %v683_v45 = vmax.f32 %v417_v40, 0.0 }
  0xe0   :  { %v1679_v43 = vpop.f32.mrf.mxu0  ;;  %1770 = vmatmul.mubr.msk.f32.gmra.mxu1 %vm742_vm2, %v681_v39 }
  0xe1   :  { %v682_v44 = vmax.f32 %v412_v42, 0.0  ;;  %v427_v46 = vadd.f32 %v1679_v43, %v2145_v2 }
  0xe2   :  { %v421_v47 = vpop.f32.mrf.mxu0 }
  0xe3   :  { %v422_v48 = vadd.f32 %v2145_v2, %v421_v47  ;;  %1772 = vmatprep.mubr.msk.f32.mxu1 %vm742_vm2, %v682_v44  ;;  %v685_v51 = vmax.f32 %v427_v46, 0.0 }
  0xe4   :  { %v1682_v49 = vpop.f32.mrf.mxu0  ;;  %1773 = vmatmul.mubr.msk.f32.gmra.mxu1 %vm742_vm2, %v683_v45 }
  0xe5   :  { %v684_v50 = vmax.f32 %v422_v48, 0.0  ;;  %v437_v52 = vadd.f32 %v1682_v49, %v2145_v2 }
  0xe6   :  { %v431_v53 = vpop.f32.mrf.mxu0 }
  0xe7   :  { %v432_v54 = vadd.f32 %v2145_v2, %v431_v53  ;;  %1775 = vmatprep.mubr.msk.f32.mxu1 %vm742_vm2, %v684_v50  ;;  %v687_v57 = vmax.f32 %v437_v52, 0.0 }
  0xe8   :  { %v1685_v55 = vpop.f32.mrf.mxu0  ;;  %1776 = vmatmul.mubr.msk.f32.gmra.mxu1 %vm742_vm2, %v685_v51 }
  0xe9   :  { %v686_v56 = vmax.f32 %v432_v54, 0.0  ;;  %v447_v58 = vadd.f32 %v1685_v55, %v2145_v2 }
  0xea   :  { %v441_v59 = vpop.f32.mrf.mxu0 }
  0xeb   :  { %v442_v60 = vadd.f32 %v2145_v2, %v441_v59  ;;  %1778 = vmatprep.mubr.msk.f32.mxu1 %vm742_vm2, %v686_v56  ;;  %v689_v63 = vmax.f32 %v447_v58, 0.0 }
  0xec   :  { %v1688_v61 = vpop.f32.mrf.mxu0  ;;  %1779 = vmatmul.mubr.msk.f32.gmra.mxu1 %vm742_vm2, %v687_v57 }
  0xed   :  { %v688_v62 = vmax.f32 %v442_v60, 0.0  ;;  %v457_v0 = vadd.f32 %v1688_v61, %v2145_v2 }
  0xee   :  { %v451_v1 = vpop.f32.mrf.mxu0 }
  0xef   :  { %v452_v3 = vadd.f32 %v2145_v2, %v451_v1  ;;  %1781 = vmatprep.mubr.msk.f32.mxu1 %vm742_vm2, %v688_v62  ;;  %v691_v6 = vmax.f32 %v457_v0, 0.0 }
  0xf0   :  { %v1691_v4 = vpop.f32.mrf.mxu0  ;;  %1782 = vmatmul.mubr.msk.f32.gmra.mxu1 %vm742_vm2, %v689_v63 }
  0xf1   :  { %v690_v5 = vmax.f32 %v452_v3, 0.0  ;;  %v467_v7 = vadd.f32 %v1691_v4, %v2145_v2 }
  0xf2   :  { %v461_v8 = vpop.f32.mrf.mxu0 }
  0xf3   :  { %v462_v9 = vadd.f32 %v2145_v2, %v461_v8  ;;  %1784 = vmatprep.mubr.msk.f32.mxu1 %vm742_vm2, %v690_v5  ;;  %v693_v12 = vmax.f32 %v467_v7, 0.0 }
  0xf4   :  { %v1694_v10 = vpop.f32.mrf.mxu0  ;;  %1785 = vmatmul.mubr.msk.f32.gmra.mxu1 %vm742_vm2, %v691_v6 }
  0xf5   :  { %v692_v11 = vmax.f32 %v462_v9, 0.0  ;;  %v477_v13 = vadd.f32 %v1694_v10, %v2145_v2 }
  0xf6   :  { %v471_v14 = vpop.f32.mrf.mxu0 }
  0xf7   :  { %v472_v15 = vadd.f32 %v2145_v2, %v471_v14  ;;  %1787 = vmatprep.mubr.msk.f32.mxu1 %vm742_vm2, %v692_v11  ;;  %v695_v18 = vmax.f32 %v477_v13, 0.0 }
  0xf8   :  { %v1697_v16 = vpop.f32.mrf.mxu0  ;;  %1788 = vmatmul.mubr.msk.f32.gmra.mxu1 %vm742_vm2, %v693_v12 }
  0xf9   :  { %v694_v17 = vmax.f32 %v472_v15, 0.0  ;;  %v487_v19 = vadd.f32 %v1697_v16, %v2145_v2 }
  0xfa   :  { %v481_v20 = vpop.f32.mrf.mxu0 }
  0xfb   :  { %v482_v21 = vadd.f32 %v2145_v2, %v481_v20  ;;  %1790 = vmatprep.mubr.msk.f32.mxu1 %vm742_vm2, %v694_v17  ;;  %v697_v24 = vmax.f32 %v487_v19, 0.0 }
  0xfc   :  { %v1700_v22 = vpop.f32.mrf.mxu0  ;;  %1791 = vmatmul.mubr.msk.f32.gmra.mxu1 %vm742_vm2, %v695_v18 }
  0xfd   :  { %v696_v23 = vmax.f32 %v482_v21, 0.0  ;;  %v497_v25 = vadd.f32 %v1700_v22, %v2145_v2 }
  0xfe   :  { %v491_v26 = vpop.f32.mrf.mxu0 }
  0xff   :  { %v492_v27 = vadd.f32 %v2145_v2, %v491_v26  ;;  %1793 = vmatprep.mubr.msk.f32.mxu1 %vm742_vm2, %v696_v23  ;;  %v699_v30 = vmax.f32 %v497_v25, 0.0 }
 0x100   :  { %v1703_v28 = vpop.f32.mrf.mxu0  ;;  %1794 = vmatmul.mubr.msk.f32.gmra.mxu1 %vm742_vm2, %v697_v24 }
 0x101   :  { %v698_v29 = vmax.f32 %v492_v27, 0.0  ;;  %v507_v31 = vadd.f32 %v1703_v28, %v2145_v2 }
 0x102   :  { %v501_v32 = vpop.f32.mrf.mxu0 }
 0x103   :  { %v502_v33 = vadd.f32 %v2145_v2, %v501_v32  ;;  %1796 = vmatprep.mubr.msk.f32.mxu1 %vm742_vm2, %v698_v29  ;;  %v701_v36 = vmax.f32 %v507_v31, 0.0 }
 0x104   :  { %v1706_v34 = vpop.f32.mrf.mxu0  ;;  %1797 = vmatmul.mubr.msk.f32.gmra.mxu1 %vm742_vm2, %v699_v30 }
 0x105   :  { %v700_v35 = vmax.f32 %v502_v33, 0.0  ;;  %v517_v37 = vadd.f32 %v1706_v34, %v2145_v2 }
 0x106   :  { %v511_v38 = vpop.f32.mrf.mxu0 }
 0x107   :  { %v512_v39 = vadd.f32 %v2145_v2, %v511_v38  ;;  %1799 = vmatprep.mubr.msk.f32.mxu1 %vm742_vm2, %v700_v35  ;;  %v703_v42 = vmax.f32 %v517_v37, 0.0 }
 0x108   :  { %v1709_v40 = vpop.f32.mrf.mxu0  ;;  %1800 = vmatmul.mubr.msk.f32.gmra.mxu1 %vm742_vm2, %v701_v36 }
 0x109   :  { %v702_v41 = vmax.f32 %v512_v39, 0.0  ;;  %v527_v43 = vadd.f32 %v1709_v40, %v2145_v2 }
 0x10a   :  { %v521_v44 = vpop.f32.mrf.mxu0 }
 0x10b   :  { %v522_v45 = vadd.f32 %v2145_v2, %v521_v44  ;;  %1802 = vmatprep.mubr.msk.f32.mxu1 %vm742_vm2, %v702_v41  ;;  %v705_v48 = vmax.f32 %v527_v43, 0.0 }
 0x10c   :  { %v1712_v46 = vpop.f32.mrf.mxu0  ;;  %1803 = vmatmul.mubr.msk.f32.gmra.mxu1 %vm742_vm2, %v703_v42 }
 0x10d   :  { %v704_v47 = vmax.f32 %v522_v45, 0.0  ;;  %v537_v49 = vadd.f32 %v1712_v46, %v2145_v2 }
 0x10e   :  { %v531_v50 = vpop.f32.mrf.mxu0 }
 0x10f   :  { %v532_v51 = vadd.f32 %v2145_v2, %v531_v50  ;;  %1805 = vmatprep.mubr.msk.f32.mxu1 %vm742_vm2, %v704_v47  ;;  %v707_v54 = vmax.f32 %v537_v49, 0.0 }
 0x110   :  { %v1715_v52 = vpop.f32.mrf.mxu0  ;;  %1806 = vmatmul.mubr.msk.f32.gmra.mxu1 %vm742_vm2, %v705_v48 }
 0x111   :  { %v706_v53 = vmax.f32 %v532_v51, 0.0  ;;  %v547_v55 = vadd.f32 %v1715_v52, %v2145_v2 }
 0x112   :  { %v541_v56 = vpop.f32.mrf.mxu0 }
 0x113   :  { %v542_v57 = vadd.f32 %v2145_v2, %v541_v56  ;;  %1808 = vmatprep.mubr.msk.f32.mxu1 %vm742_vm2, %v706_v53  ;;  %v709_v60 = vmax.f32 %v547_v55, 0.0 }
 0x114   :  { %v1718_v58 = vpop.f32.mrf.mxu0  ;;  %1809 = vmatmul.mubr.msk.f32.gmra.mxu1 %vm742_vm2, %v707_v54 }
 0x115   :  { %v708_v59 = vmax.f32 %v542_v57, 0.0  ;;  %v557_v61 = vadd.f32 %v1718_v58, %v2145_v2 }
 0x116   :  { %v551_v62 = vpop.f32.mrf.mxu0 }
 0x117   :  { %v552_v63 = vadd.f32 %v2145_v2, %v551_v62  ;;  %1811 = vmatprep.mubr.msk.f32.mxu1 %vm742_vm2, %v708_v59  ;;  %v711_v3 = vmax.f32 %v557_v61, 0.0 }
 0x118   :  { %v1721_v0 = vpop.f32.mrf.mxu0  ;;  %1812 = vmatmul.mubr.msk.f32.gmra.mxu1 %vm742_vm2, %v709_v60 }
 0x119   :  { %v710_v1 = vmax.f32 %v552_v63, 0.0  ;;  %v567_v4 = vadd.f32 %v1721_v0, %v2145_v2 }
 0x11a   :  { %v561_v5 = vpop.f32.mrf.mxu0 }
 0x11b   :  { %v562_v6 = vadd.f32 %v2145_v2, %v561_v5  ;;  %1814 = vmatprep.mubr.msk.f32.mxu1 %vm742_vm2, %v710_v1  ;;  %v713_v9 = vmax.f32 %v567_v4, 0.0 }
 0x11c   :  { %v1724_v7 = vpop.f32.mrf.mxu0  ;;  %1815 = vmatmul.mubr.msk.f32.gmra.mxu1 %vm742_vm2, %v711_v3 }
 0x11d   :  { %v712_v8 = vmax.f32 %v562_v6, 0.0  ;;  %v577_v10 = vadd.f32 %v1724_v7, %v2145_v2  ;;  %v2278_v6 = vld [vmem:[%s2604_s4] ss:$0 sm:$0xff] }
 0x11e   :  { %v571_v11 = vpop.f32.mrf.mxu0 }
 0x11f   :  { %v572_v12 = vadd.f32 %v2145_v2, %v571_v11  ;;  %1817 = vmatprep.mubr.msk.f32.mxu1 %vm742_vm2, %v712_v8  ;;  %v715_v15 = vmax.f32 %v577_v10, 0.0 }
 0x120   :  { %v1727_v13 = vpop.f32.mrf.mxu0  ;;  %1818 = vmatmul.mubr.msk.f32.gmra.mxu1 %vm742_vm2, %v713_v9 }
 0x121   :  { %v714_v14 = vmax.f32 %v572_v12, 0.0  ;;  %v587_v16 = vadd.f32 %v1727_v13, %v2145_v2 }
 0x122   :  { %v581_v17 = vpop.f32.mrf.mxu0 }
 0x123   :  { %v582_v18 = vadd.f32 %v2145_v2, %v581_v17  ;;  %1820 = vmatprep.mubr.msk.f32.mxu1 %vm742_vm2, %v714_v14  ;;  %v717_v21 = vmax.f32 %v587_v16, 0.0 }
 0x124   :  { %v1730_v19 = vpop.f32.mrf.mxu0  ;;  %1821 = vmatmul.mubr.msk.f32.gmra.mxu1 %vm742_vm2, %v715_v15 }
 0x125   :  { %v716_v20 = vmax.f32 %v582_v18, 0.0  ;;  %v597_v22 = vadd.f32 %v1730_v19, %v2145_v2 }
 0x126   :  { %v591_v23 = vpop.f32.mrf.mxu0 }
 0x127   :  { %v592_v24 = vadd.f32 %v2145_v2, %v591_v23  ;;  %1823 = vmatprep.mubr.msk.f32.mxu1 %vm742_vm2, %v716_v20  ;;  %v719_v27 = vmax.f32 %v597_v22, 0.0 }
 0x128   :  { %v1733_v25 = vpop.f32.mrf.mxu0  ;;  %1824 = vmatmul.mubr.msk.f32.gmra.mxu1 %vm742_vm2, %v717_v21 }
 0x129   :  { %v718_v26 = vmax.f32 %v592_v24, 0.0  ;;  %v607_v28 = vadd.f32 %v1733_v25, %v2145_v2 }
 0x12a   :  { %v601_v29 = vpop.f32.mrf.mxu0 }
 0x12b   :  { %v602_v30 = vadd.f32 %v2145_v2, %v601_v29  ;;  %1826 = vmatprep.mubr.msk.f32.mxu1 %vm742_vm2, %v718_v26  ;;  %v721_v33 = vmax.f32 %v607_v28, 0.0 }
 0x12c   :  { %v1736_v31 = vpop.f32.mrf.mxu0  ;;  %1827 = vmatmul.mubr.msk.f32.gmra.mxu1 %vm742_vm2, %v719_v27 }
 0x12d   :  { %v720_v32 = vmax.f32 %v602_v30, 0.0  ;;  %v617_v34 = vadd.f32 %v1736_v31, %v2145_v2 }
 0x12e   :  { %v611_v35 = vpop.f32.mrf.mxu0 }
 0x12f   :  { %v612_v36 = vadd.f32 %v2145_v2, %v611_v35  ;;  %1829 = vmatprep.mubr.msk.f32.mxu1 %vm742_vm2, %v720_v32  ;;  %v723_v39 = vmax.f32 %v617_v34, 0.0 }
 0x130   :  { %v1739_v37 = vpop.f32.mrf.mxu0  ;;  %1830 = vmatmul.mubr.msk.f32.gmra.mxu1 %vm742_vm2, %v721_v33 }
 0x131   :  { %v722_v38 = vmax.f32 %v612_v36, 0.0  ;;  %v627_v40 = vadd.f32 %v1739_v37, %v2145_v2 }
 0x132   :  { %v621_v41 = vpop.f32.mrf.mxu0 }
 0x133   :  { %v622_v42 = vadd.f32 %v2145_v2, %v621_v41  ;;  %1832 = vmatprep.mubr.msk.f32.mxu1 %vm742_vm2, %v722_v38  ;;  %v725_v45 = vmax.f32 %v627_v40, 0.0 }
 0x134   :  { %v1742_v43 = vpop.f32.mrf.mxu0  ;;  %1833 = vmatmul.mubr.msk.f32.gmra.mxu1 %vm742_vm2, %v723_v39 }
 0x135   :  { %v724_v44 = vmax.f32 %v622_v42, 0.0  ;;  %v637_v46 = vadd.f32 %v1742_v43, %v2145_v2 }
 0x136   :  { %v631_v47 = vpop.f32.mrf.mxu0 }
 0x137   :  { %v632_v48 = vadd.f32 %v2145_v2, %v631_v47  ;;  %1835 = vmatprep.mubr.msk.f32.mxu1 %vm742_vm2, %v724_v44  ;;  %v727_v51 = vmax.f32 %v637_v46, 0.0 }
 0x138   :  { %v1745_v49 = vpop.f32.mrf.mxu0  ;;  %1836 = vmatmul.mubr.msk.f32.gmra.mxu1 %vm742_vm2, %v725_v45 }
 0x139   :  { %v726_v50 = vmax.f32 %v632_v48, 0.0  ;;  %v647_v52 = vadd.f32 %v1745_v49, %v2145_v2 }
 0x13a   :  { %v641_v53 = vpop.f32.mrf.mxu0 }
 0x13b   :  { %v642_v54 = vadd.f32 %v2145_v2, %v641_v53  ;;  %1838 = vmatprep.mubr.msk.f32.mxu1 %vm742_vm2, %v726_v50  ;;  %v729_v57 = vmax.f32 %v647_v52, 0.0 }
 0x13c   :  { %v1748_v55 = vpop.f32.mrf.mxu0  ;;  %1839 = vmatmul.mubr.msk.f32.gmra.mxu1 %vm742_vm2, %v727_v51 }
 0x13d   :  { %v728_v56 = vmax.f32 %v642_v54, 0.0  ;;  %v657_v58 = vadd.f32 %v1748_v55, %v2145_v2 }
 0x13e   :  { %v651_v59 = vpop.f32.mrf.mxu0 }
 0x13f   :  { %v652_v60 = vadd.f32 %v2145_v2, %v651_v59  ;;  %1841 = vmatprep.mubr.msk.f32.mxu1 %vm742_vm2, %v728_v56  ;;  %v731_v63 = vmax.f32 %v657_v58, 0.0 }
 0x140   :  { %v1751_v61 = vpop.f32.mrf.mxu0  ;;  %1842 = vmatmul.mubr.msk.f32.gmra.mxu1 %vm742_vm2, %v729_v57 }
 0x141   :  { %v730_v62 = vmax.f32 %v652_v60, 0.0  ;;  %v667_v0 = vadd.f32 %v1751_v61, %v2145_v2 }
 0x142   :  { %v661_v1 = vpop.f32.mrf.mxu0 }
 0x143   :  { %v662_v3 = vadd.f32 %v2145_v2, %v661_v1  ;;  %1844 = vmatprep.mubr.msk.f32.mxu1 %vm742_vm2, %v730_v62  ;;  %v733_v5 = vmax.f32 %v667_v0, 0.0 }
 0x144   :  { %1845 = vmatmul.mubr.msk.f32.gmra.mxu1 %vm742_vm2, %v731_v63 }
 0x145   :  { %v732_v4 = vmax.f32 %v662_v3, 0.0 }
 0x147   :  { %1847 = vmatprep.mubr.msk.f32.mxu1 %vm742_vm2, %v732_v4 }
 0x148   :  { %1848 = vmatmul.mubr.msk.f32.gmra.mxu1 %vm742_vm2, %v733_v5 }
 0x18c   :  { %v1756_v7 = vpop.f32.mrf.mxu1 }
 0x18d   :  { %v1011_v8 = vadd.f32 %v1756_v7, %v2278_v6 }
 0x18e   :  { %v1005_v2 = vpop.f32.mrf.mxu1 }
 0x18f   :  { %1326 = vst.msk [vmem:[%s2605_s5 + $0x8] sm:$0xff] %vm1324_vm3, %v1011_v8  ;;  %v1006_v9 = vadd.f32 %v2278_v6, %v1005_v2 }
 0x190   :  { %v1759_v10 = vpop.f32.mrf.mxu1 }
 0x191   :  { %1325 = vst.msk [vmem:[%s2605_s5] sm:$0xff] %vm1324_vm3, %v1006_v9  ;;  %v1021_v11 = vadd.f32 %v1759_v10, %v2278_v6 }
 0x192   :  { %v1015_v12 = vpop.f32.mrf.mxu1 }
 0x193   :  { %1328 = vst.msk [vmem:[%s2605_s5 + $0x18] sm:$0xff] %vm1324_vm3, %v1021_v11  ;;  %v1016_v13 = vadd.f32 %v2278_v6, %v1015_v12 }
 0x194   :  { %v1762_v14 = vpop.f32.mrf.mxu1 }
 0x195   :  { %1327 = vst.msk [vmem:[%s2605_s5 + $0x10] sm:$0xff] %vm1324_vm3, %v1016_v13  ;;  %v1031_v15 = vadd.f32 %v1762_v14, %v2278_v6 }
 0x196   :  { %v1025_v16 = vpop.f32.mrf.mxu1 }
 0x197   :  { %1330 = vst.msk [vmem:[%s2605_s5 + $0x28] sm:$0xff] %vm1324_vm3, %v1031_v15  ;;  %v1026_v17 = vadd.f32 %v2278_v6, %v1025_v16 }
 0x198   :  { %v1765_v18 = vpop.f32.mrf.mxu1 }
 0x199   :  { %1329 = vst.msk [vmem:[%s2605_s5 + $0x20] sm:$0xff] %vm1324_vm3, %v1026_v17  ;;  %v1041_v19 = vadd.f32 %v1765_v18, %v2278_v6 }
 0x19a   :  { %v1035_v20 = vpop.f32.mrf.mxu1 }
 0x19b   :  { %1332 = vst.msk [vmem:[%s2605_s5 + $0x38] sm:$0xff] %vm1324_vm3, %v1041_v19  ;;  %v1036_v21 = vadd.f32 %v2278_v6, %v1035_v20 }
 0x19c   :  { %v1768_v22 = vpop.f32.mrf.mxu1 }
 0x19d   :  { %1331 = vst.msk [vmem:[%s2605_s5 + $0x30] sm:$0xff] %vm1324_vm3, %v1036_v21  ;;  %v1051_v23 = vadd.f32 %v1768_v22, %v2278_v6 }
 0x19e   :  { %v1045_v24 = vpop.f32.mrf.mxu1 }
 0x19f   :  { %1334 = vst.msk [vmem:[%s2605_s5 + $0x48] sm:$0xff] %vm1324_vm3, %v1051_v23  ;;  %v1046_v25 = vadd.f32 %v2278_v6, %v1045_v24 }
 0x1a0   :  { %v1771_v26 = vpop.f32.mrf.mxu1 }
 0x1a1   :  { %1333 = vst.msk [vmem:[%s2605_s5 + $0x40] sm:$0xff] %vm1324_vm3, %v1046_v25  ;;  %v1061_v27 = vadd.f32 %v1771_v26, %v2278_v6 }
 0x1a2   :  { %v1055_v28 = vpop.f32.mrf.mxu1 }
 0x1a3   :  { %1336 = vst.msk [vmem:[%s2605_s5 + $0x58] sm:$0xff] %vm1324_vm3, %v1061_v27  ;;  %v1056_v29 = vadd.f32 %v2278_v6, %v1055_v28 }
 0x1a4   :  { %v1774_v30 = vpop.f32.mrf.mxu1 }
 0x1a5   :  { %1335 = vst.msk [vmem:[%s2605_s5 + $0x50] sm:$0xff] %vm1324_vm3, %v1056_v29  ;;  %v1071_v31 = vadd.f32 %v1774_v30, %v2278_v6 }
 0x1a6   :  { %v1065_v32 = vpop.f32.mrf.mxu1 }
 0x1a7   :  { %1338 = vst.msk [vmem:[%s2605_s5 + $0x68] sm:$0xff] %vm1324_vm3, %v1071_v31  ;;  %v1066_v33 = vadd.f32 %v2278_v6, %v1065_v32 }
 0x1a8   :  { %v1777_v34 = vpop.f32.mrf.mxu1 }
 0x1a9   :  { %1337 = vst.msk [vmem:[%s2605_s5 + $0x60] sm:$0xff] %vm1324_vm3, %v1066_v33  ;;  %v1081_v35 = vadd.f32 %v1777_v34, %v2278_v6 }
 0x1aa   :  { %v1075_v36 = vpop.f32.mrf.mxu1 }
 0x1ab   :  { %1340 = vst.msk [vmem:[%s2605_s5 + $0x78] sm:$0xff] %vm1324_vm3, %v1081_v35  ;;  %v1076_v37 = vadd.f32 %v2278_v6, %v1075_v36 }
 0x1ac   :  { %v1780_v38 = vpop.f32.mrf.mxu1 }
 0x1ad   :  { %1339 = vst.msk [vmem:[%s2605_s5 + $0x70] sm:$0xff] %vm1324_vm3, %v1076_v37  ;;  %v1091_v39 = vadd.f32 %v1780_v38, %v2278_v6 }
 0x1ae   :  { %v1085_v40 = vpop.f32.mrf.mxu1 }
 0x1af   :  { %1342 = vst.msk [vmem:[%s2605_s5 + $0x88] sm:$0xff] %vm1324_vm3, %v1091_v39  ;;  %v1086_v41 = vadd.f32 %v2278_v6, %v1085_v40 }
 0x1b0   :  { %v1783_v42 = vpop.f32.mrf.mxu1 }
 0x1b1   :  { %1341 = vst.msk [vmem:[%s2605_s5 + $0x80] sm:$0xff] %vm1324_vm3, %v1086_v41  ;;  %v1101_v43 = vadd.f32 %v1783_v42, %v2278_v6 }
 0x1b2   :  { %v1095_v44 = vpop.f32.mrf.mxu1 }
 0x1b3   :  { %1344 = vst.msk [vmem:[%s2605_s5 + $0x98] sm:$0xff] %vm1324_vm3, %v1101_v43  ;;  %v1096_v45 = vadd.f32 %v2278_v6, %v1095_v44 }
 0x1b4   :  { %v1786_v46 = vpop.f32.mrf.mxu1 }
 0x1b5   :  { %1343 = vst.msk [vmem:[%s2605_s5 + $0x90] sm:$0xff] %vm1324_vm3, %v1096_v45  ;;  %v1111_v47 = vadd.f32 %v1786_v46, %v2278_v6 }
 0x1b6   :  { %v1105_v48 = vpop.f32.mrf.mxu1 }
 0x1b7   :  { %1346 = vst.msk [vmem:[%s2605_s5 + $0xa8] sm:$0xff] %vm1324_vm3, %v1111_v47  ;;  %v1106_v49 = vadd.f32 %v2278_v6, %v1105_v48 }
 0x1b8   :  { %v1789_v50 = vpop.f32.mrf.mxu1 }
 0x1b9   :  { %1345 = vst.msk [vmem:[%s2605_s5 + $0xa0] sm:$0xff] %vm1324_vm3, %v1106_v49  ;;  %v1121_v51 = vadd.f32 %v1789_v50, %v2278_v6 }
 0x1ba   :  { %v1115_v52 = vpop.f32.mrf.mxu1 }
 0x1bb   :  { %1348 = vst.msk [vmem:[%s2605_s5 + $0xb8] sm:$0xff] %vm1324_vm3, %v1121_v51  ;;  %v1116_v53 = vadd.f32 %v2278_v6, %v1115_v52 }
 0x1bc   :  { %v1792_v54 = vpop.f32.mrf.mxu1 }
 0x1bd   :  { %1347 = vst.msk [vmem:[%s2605_s5 + $0xb0] sm:$0xff] %vm1324_vm3, %v1116_v53  ;;  %v1131_v55 = vadd.f32 %v1792_v54, %v2278_v6 }
 0x1be   :  { %v1125_v56 = vpop.f32.mrf.mxu1 }
 0x1bf   :  { %1350 = vst.msk [vmem:[%s2605_s5 + $0xc8] sm:$0xff] %vm1324_vm3, %v1131_v55  ;;  %v1126_v57 = vadd.f32 %v2278_v6, %v1125_v56 }
 0x1c0   :  { %v1795_v58 = vpop.f32.mrf.mxu1 }
 0x1c1   :  { %1349 = vst.msk [vmem:[%s2605_s5 + $0xc0] sm:$0xff] %vm1324_vm3, %v1126_v57  ;;  %v1141_v59 = vadd.f32 %v1795_v58, %v2278_v6 }
 0x1c2   :  { %v1135_v60 = vpop.f32.mrf.mxu1 }
 0x1c3   :  { %1352 = vst.msk [vmem:[%s2605_s5 + $0xd8] sm:$0xff] %vm1324_vm3, %v1141_v59  ;;  %v1136_v61 = vadd.f32 %v2278_v6, %v1135_v60 }
 0x1c4   :  { %v1798_v62 = vpop.f32.mrf.mxu1 }
 0x1c5   :  { %1351 = vst.msk [vmem:[%s2605_s5 + $0xd0] sm:$0xff] %vm1324_vm3, %v1136_v61  ;;  %v1151_v63 = vadd.f32 %v1798_v62, %v2278_v6 }
 0x1c6   :  { %v1145_v0 = vpop.f32.mrf.mxu1 }
 0x1c7   :  { %1354 = vst.msk [vmem:[%s2605_s5 + $0xe8] sm:$0xff] %vm1324_vm3, %v1151_v63  ;;  %v1146_v1 = vadd.f32 %v2278_v6, %v1145_v0 }
 0x1c8   :  { %v1801_v3 = vpop.f32.mrf.mxu1 }
 0x1c9   :  { %1353 = vst.msk [vmem:[%s2605_s5 + $0xe0] sm:$0xff] %vm1324_vm3, %v1146_v1  ;;  %v1161_v4 = vadd.f32 %v1801_v3, %v2278_v6 }
 0x1ca   :  { %v1155_v5 = vpop.f32.mrf.mxu1 }
 0x1cb   :  { %1356 = vst.msk [vmem:[%s2605_s5 + $0xf8] sm:$0xff] %vm1324_vm3, %v1161_v4  ;;  %v1156_v7 = vadd.f32 %v2278_v6, %v1155_v5 }
 0x1cc   :  { %v1804_v8 = vpop.f32.mrf.mxu1 }
 0x1cd   :  { %1355 = vst.msk [vmem:[%s2605_s5 + $0xf0] sm:$0xff] %vm1324_vm3, %v1156_v7  ;;  %v1171_v2 = vadd.f32 %v1804_v8, %v2278_v6 }
 0x1ce   :  { %v1165_v9 = vpop.f32.mrf.mxu1 }
 0x1cf   :  { %1358 = vst.msk [vmem:[%s2605_s5 + $0x108] sm:$0xff] %vm1324_vm3, %v1171_v2  ;;  %v1166_v10 = vadd.f32 %v2278_v6, %v1165_v9 }
 0x1d0   :  { %v1807_v11 = vpop.f32.mrf.mxu1 }
 0x1d1   :  { %1357 = vst.msk [vmem:[%s2605_s5 + $0x100] sm:$0xff] %vm1324_vm3, %v1166_v10  ;;  %v1181_v12 = vadd.f32 %v1807_v11, %v2278_v6 }
 0x1d2   :  { %v1175_v13 = vpop.f32.mrf.mxu1 }
 0x1d3   :  { %1360 = vst.msk [vmem:[%s2605_s5 + $0x118] sm:$0xff] %vm1324_vm3, %v1181_v12  ;;  %v1176_v14 = vadd.f32 %v2278_v6, %v1175_v13 }
 0x1d4   :  { %v1810_v15 = vpop.f32.mrf.mxu1 }
 0x1d5   :  { %1359 = vst.msk [vmem:[%s2605_s5 + $0x110] sm:$0xff] %vm1324_vm3, %v1176_v14  ;;  %v1191_v16 = vadd.f32 %v1810_v15, %v2278_v6 }
 0x1d6   :  { %v1185_v17 = vpop.f32.mrf.mxu1 }
 0x1d7   :  { %1362 = vst.msk [vmem:[%s2605_s5 + $0x128] sm:$0xff] %vm1324_vm3, %v1191_v16  ;;  %v1186_v18 = vadd.f32 %v2278_v6, %v1185_v17 }
 0x1d8   :  { %v1813_v19 = vpop.f32.mrf.mxu1 }
 0x1d9   :  { %1361 = vst.msk [vmem:[%s2605_s5 + $0x120] sm:$0xff] %vm1324_vm3, %v1186_v18  ;;  %v1201_v20 = vadd.f32 %v1813_v19, %v2278_v6 }
 0x1da   :  { %v1195_v21 = vpop.f32.mrf.mxu1 }
 0x1db   :  { %1364 = vst.msk [vmem:[%s2605_s5 + $0x138] sm:$0xff] %vm1324_vm3, %v1201_v20  ;;  %v1196_v22 = vadd.f32 %v2278_v6, %v1195_v21 }
 0x1dc   :  { %v1816_v23 = vpop.f32.mrf.mxu1 }
 0x1dd   :  { %1363 = vst.msk [vmem:[%s2605_s5 + $0x130] sm:$0xff] %vm1324_vm3, %v1196_v22  ;;  %v1211_v24 = vadd.f32 %v1816_v23, %v2278_v6 }
 0x1de   :  { %v1205_v25 = vpop.f32.mrf.mxu1 }
 0x1df   :  { %1366 = vst.msk [vmem:[%s2605_s5 + $0x148] sm:$0xff] %vm1324_vm3, %v1211_v24  ;;  %v1206_v26 = vadd.f32 %v2278_v6, %v1205_v25 }
 0x1e0   :  { %v1819_v27 = vpop.f32.mrf.mxu1 }
 0x1e1   :  { %1365 = vst.msk [vmem:[%s2605_s5 + $0x140] sm:$0xff] %vm1324_vm3, %v1206_v26  ;;  %v1221_v28 = vadd.f32 %v1819_v27, %v2278_v6 }
 0x1e2   :  { %v1215_v29 = vpop.f32.mrf.mxu1 }
 0x1e3   :  { %1368 = vst.msk [vmem:[%s2605_s5 + $0x158] sm:$0xff] %vm1324_vm3, %v1221_v28  ;;  %v1216_v30 = vadd.f32 %v2278_v6, %v1215_v29 }
 0x1e4   :  { %v1822_v31 = vpop.f32.mrf.mxu1 }
 0x1e5   :  { %1367 = vst.msk [vmem:[%s2605_s5 + $0x150] sm:$0xff] %vm1324_vm3, %v1216_v30  ;;  %v1231_v32 = vadd.f32 %v1822_v31, %v2278_v6 }
 0x1e6   :  { %v1225_v33 = vpop.f32.mrf.mxu1 }
 0x1e7   :  { %1370 = vst.msk [vmem:[%s2605_s5 + $0x168] sm:$0xff] %vm1324_vm3, %v1231_v32  ;;  %v1226_v34 = vadd.f32 %v2278_v6, %v1225_v33 }
 0x1e8   :  { %v1825_v35 = vpop.f32.mrf.mxu1 }
 0x1e9   :  { %1369 = vst.msk [vmem:[%s2605_s5 + $0x160] sm:$0xff] %vm1324_vm3, %v1226_v34  ;;  %v1241_v36 = vadd.f32 %v1825_v35, %v2278_v6 }
 0x1ea   :  { %v1235_v37 = vpop.f32.mrf.mxu1 }
 0x1eb   :  { %1372 = vst.msk [vmem:[%s2605_s5 + $0x178] sm:$0xff] %vm1324_vm3, %v1241_v36  ;;  %v1236_v38 = vadd.f32 %v2278_v6, %v1235_v37 }
 0x1ec   :  { %v1828_v39 = vpop.f32.mrf.mxu1 }
 0x1ed   :  { %1371 = vst.msk [vmem:[%s2605_s5 + $0x170] sm:$0xff] %vm1324_vm3, %v1236_v38  ;;  %v1251_v40 = vadd.f32 %v1828_v39, %v2278_v6 }
 0x1ee   :  { %v1245_v41 = vpop.f32.mrf.mxu1 }
 0x1ef   :  { %1374 = vst.msk [vmem:[%s2605_s5 + $0x188] sm:$0xff] %vm1324_vm3, %v1251_v40  ;;  %v1246_v42 = vadd.f32 %v2278_v6, %v1245_v41 }
 0x1f0   :  { %v1831_v43 = vpop.f32.mrf.mxu1 }
 0x1f1   :  { %1373 = vst.msk [vmem:[%s2605_s5 + $0x180] sm:$0xff] %vm1324_vm3, %v1246_v42  ;;  %v1261_v44 = vadd.f32 %v1831_v43, %v2278_v6 }
 0x1f2   :  { %v1255_v45 = vpop.f32.mrf.mxu1 }
 0x1f3   :  { %1376 = vst.msk [vmem:[%s2605_s5 + $0x198] sm:$0xff] %vm1324_vm3, %v1261_v44  ;;  %v1256_v46 = vadd.f32 %v2278_v6, %v1255_v45 }
 0x1f4   :  { %v1834_v47 = vpop.f32.mrf.mxu1 }
 0x1f5   :  { %1375 = vst.msk [vmem:[%s2605_s5 + $0x190] sm:$0xff] %vm1324_vm3, %v1256_v46  ;;  %v1271_v48 = vadd.f32 %v1834_v47, %v2278_v6 }
 0x1f6   :  { %v1265_v49 = vpop.f32.mrf.mxu1 }
 0x1f7   :  { %1378 = vst.msk [vmem:[%s2605_s5 + $0x1a8] sm:$0xff] %vm1324_vm3, %v1271_v48  ;;  %v1266_v50 = vadd.f32 %v2278_v6, %v1265_v49 }
 0x1f8   :  { %v1837_v51 = vpop.f32.mrf.mxu1 }
 0x1f9   :  { %1377 = vst.msk [vmem:[%s2605_s5 + $0x1a0] sm:$0xff] %vm1324_vm3, %v1266_v50  ;;  %v1281_v52 = vadd.f32 %v1837_v51, %v2278_v6 }
 0x1fa   :  { %v1275_v53 = vpop.f32.mrf.mxu1 }
 0x1fb   :  { %1380 = vst.msk [vmem:[%s2605_s5 + $0x1b8] sm:$0xff] %vm1324_vm3, %v1281_v52  ;;  %v1276_v54 = vadd.f32 %v2278_v6, %v1275_v53 }
 0x1fc   :  { %v1840_v55 = vpop.f32.mrf.mxu1 }
 0x1fd   :  { %1379 = vst.msk [vmem:[%s2605_s5 + $0x1b0] sm:$0xff] %vm1324_vm3, %v1276_v54  ;;  %v1291_v56 = vadd.f32 %v1840_v55, %v2278_v6 }
 0x1fe   :  { %v1285_v57 = vpop.f32.mrf.mxu1 }
 0x1ff   :  { %1382 = vst.msk [vmem:[%s2605_s5 + $0x1c8] sm:$0xff] %vm1324_vm3, %v1291_v56  ;;  %v1286_v58 = vadd.f32 %v2278_v6, %v1285_v57 }
 0x200   :  { %v1843_v59 = vpop.f32.mrf.mxu1 }
 0x201   :  { %1381 = vst.msk [vmem:[%s2605_s5 + $0x1c0] sm:$0xff] %vm1324_vm3, %v1286_v58  ;;  %v1301_v60 = vadd.f32 %v1843_v59, %v2278_v6 }
 0x202   :  { %v1295_v61 = vpop.f32.mrf.mxu1 }
 0x203   :  { %1384 = vst.msk [vmem:[%s2605_s5 + $0x1d8] sm:$0xff] %vm1324_vm3, %v1301_v60  ;;  %v1296_v62 = vadd.f32 %v2278_v6, %v1295_v61 }
 0x204   :  { %v1846_v63 = vpop.f32.mrf.mxu1 }
 0x205   :  { %1383 = vst.msk [vmem:[%s2605_s5 + $0x1d0] sm:$0xff] %vm1324_vm3, %v1296_v62  ;;  %v1311_v0 = vadd.f32 %v1846_v63, %v2278_v6 }
 0x206   :  { %v1305_v1 = vpop.f32.mrf.mxu1 }
 0x207   :  { %1386 = vst.msk [vmem:[%s2605_s5 + $0x1e8] sm:$0xff] %vm1324_vm3, %v1311_v0  ;;  %v1306_v3 = vadd.f32 %v2278_v6, %v1305_v1 }
 0x208   :  { %v1849_v4 = vpop.f32.mrf.mxu1 }
 0x209   :  { %1385 = vst.msk [vmem:[%s2605_s5 + $0x1e0] sm:$0xff] %vm1324_vm3, %v1306_v3  ;;  %v1321_v5 = vadd.f32 %v1849_v4, %v2278_v6 }
 0x20a   :  { %v1315_v7 = vpop.f32.mrf.mxu1 }
 0x20b   :  { %1388 = vst.msk [vmem:[%s2605_s5 + $0x1f8] sm:$0xff] %vm1324_vm3, %v1321_v5  ;;  %v1316_v8 = vadd.f32 %v2278_v6, %v1315_v7 }
 0x20d   :  { %1387 = vst.msk [vmem:[%s2605_s5 + $0x1f0] sm:$0xff] %vm1324_vm3, %v1316_v8 }

</bundles_post_ra>
